<compile_context>
chip_gen: v6e
topology: v6e:2x2x1
jax: 0.10.0
libtpu: 0.0.40
codegen_flags: <defaults>
</compile_context>

<pallas_src>
import jax
import jax.numpy as jnp
from jax.experimental import pallas as pl
from jax.experimental.pallas import tpu as pltpu

LN_EPS = 1e-5  # PyTorch nn.LayerNorm default eps


def film2d_kernel(x_ref, g_ref, b_ref, o_ref):
    # x_ref: (TB, C, T)   g_ref/b_ref: (TB, C, 1)   o_ref: (TB, C, T)
    x = x_ref[...].astype(jnp.float32)                       # (TB, C, T)
    inv_c = 1.0 / x.shape[1]

    # Single read pass: sum and sum-of-squares over the channel (sublane) axis.
    s1 = jnp.sum(x, axis=1, keepdims=True)                   # (TB, 1, T)
    s2 = jnp.sum(x * x, axis=1, keepdims=True)                # (TB, 1, T)
    mean = s1 * inv_c
    var = s2 * inv_c - mean * mean                            # biased variance (f32)
    inv_std = jax.lax.rsqrt(var + LN_EPS)                     # (TB, 1, T)

    g = g_ref[...].astype(jnp.float32)                        # (TB, C, 1)
    b = b_ref[...].astype(jnp.float32)                        # (TB, C, 1)

    # Single write pass, fused normalize + FiLM.
    # NOTE: on v7x the two channel reductions above could additionally ride
    # the idle MXU (dot with a ones[8 x C] operand) to keep the binding slot
    # at HBM DMA; left on the VPU here since v5e/v6e have ample VALU slack.
    scale = g * inv_std                                        # (TB, C, T)
    o_ref[...] = ((x - mean) * scale + b).astype(o_ref.dtype)


def _vmem_budget_and_limit():
    """Generation-aware scoped-VMEM limit and the tile budget derived from it."""
    try:
        cap = int(pltpu.get_tpu_info().vmem_capacity_bytes)
    except Exception:
        cap = 64 * 1024 * 1024  # conservative fallback: v7x per-TC capacity
    # v5e/v6e (128 MiB physical): limit 64 MiB.  v7x (64 MiB per TC): ~44 MiB.
    limit = min(int(cap * 0.70), 64 * 1024 * 1024)
    limit = max(limit, 32 * 1024 * 1024)
    budget = int(limit * 0.80)  # headroom for Mosaic internals / semaphores
    return budget, limit


def _pick_tiles(B, C, HW, itemsize, vmem_budget_bytes):
    """Pick (TB, T_HW, n_hw_tiles) for a (TB, C, T_HW) block.

    Per lane column the block costs roughly
      C * (2*itemsize [input, double-buffered] + 2*itemsize [output, d-buf]
           + ~12 bytes of in-kernel f32 working set)
    which also covers bf16 inputs whose LN math is done in f32.
    """
    per_col = C * (4 * itemsize + 12)
    max_cols = max(int(vmem_budget_bytes // per_col), 128)  # budget on TB * T_HW

    if HW < 128:
        # Tiny spatial extent: full-extent (legal) block, single tile.
        t_hw, n_hw = HW, 1
    elif HW % 128 == 0:
        # Largest multiple of 128 dividing HW that fits the budget.
        t_hw, cand = 128, 128
        while cand <= HW:
            if HW % cand == 0 and cand <= max_cols:
                t_hw = cand
            cand += 128
        n_hw = HW // t_hw
    else:
        # HW not lane-aligned: fixed lane tile + cdiv grid; Pallas masks the
        # final partial block (reduction is over C, padded lanes are harmless).
        t_hw = min(2048, max(128, (max_cols // 128) * 128))
        t_hw = min(t_hw, ((HW + 127) // 128) * 128)
        n_hw = pl.cdiv(HW, t_hw)

    # When one lane tile already covers HW, block over batch too so small
    # images still present big per-grid-step work.
    tb = 1
    if n_hw == 1:
        max_tb = max(int(max_cols // max(t_hw, 1)), 1)
        for cand in range(min(B, max_tb), 0, -1):
            if B % cand == 0:
                tb = cand
                break
    return tb, t_hw, n_hw


def film2d(x_nchw, t, wg, bg, wb, bb):
    """x_nchw: (B, C, H, W); t: (B, d_t); wg/wb: (d_t, C); bg/bb: (C,)."""
    B, C, H, W = x_nchw.shape
    HW = H * W

    # Native layout: (B, C, HW) -- free reshape, no transpose / extra HBM traffic.
    x_bchw = x_nchw.reshape(B, C, HW)

    # Hoist the tiny FiLM matmuls out of the hot loop (one XLA matmul each).
    g = (t.astype(jnp.float32) @ wg.astype(jnp.float32) + bg.astype(jnp.float32))
    b = (t.astype(jnp.float32) @ wb.astype(jnp.float32) + bb.astype(jnp.float32))
    g = g[:, :, None]   # (B, C, 1): channels on the sublane axis in-kernel
    b = b[:, :, None]

    vmem_budget, vmem_limit = _vmem_budget_and_limit()
    TB, T_HW, n_hw = _pick_tiles(B, C, HW, x_nchw.dtype.itemsize, vmem_budget)

    out_bchw = pl.pallas_call(
        film2d_kernel,
        out_shape=jax.ShapeDtypeStruct((B, C, HW), x_nchw.dtype),
        grid=(B // TB, n_hw),
        in_specs=[
            pl.BlockSpec((TB, C, T_HW), lambda i, j: (i, 0, j)),  # x tile
            pl.BlockSpec((TB, C, 1), lambda i, j: (i, 0, 0)),     # gamma (per batch)
            pl.BlockSpec((TB, C, 1), lambda i, j: (i, 0, 0)),     # beta  (per batch)
        ],
        out_specs=pl.BlockSpec((TB, C, T_HW), lambda i, j: (i, 0, j)),
        compiler_params=pltpu.CompilerParams(
            dimension_semantics=("parallel", "parallel"),
            vmem_limit_bytes=vmem_limit,
        ),
    )(x_bchw, g, b)

    return out_bchw.reshape(B, C, H, W)


def film2d_reference(x_nchw, t, wg, bg, wb, bb):
    """Pure-JAX reference mirroring the PyTorch forward."""
    g = t @ wg + bg                     # (B, C)
    b = t @ wb + bb                     # (B, C)
    x_nhwc = jnp.transpose(x_nchw, (0, 2, 3, 1))
    mean = jnp.mean(x_nhwc, axis=-1, keepdims=True)
    var = jnp.mean((x_nhwc - mean) ** 2, axis=-1, keepdims=True)
    x_norm = (x_nhwc - mean) / jnp.sqrt(var + LN_EPS)
    x_norm = jnp.transpose(x_norm, (0, 3, 1, 2))
    return g[:, :, None, None] * x_norm + b[:, :, None, None]


if __name__ == "__main__":
    # Small shapes consistent with the module: d_model = C (channels), d_t = cond dim.
    B, C, H, W = 2, 32, 16, 16
    d_t = 16

    key = jax.random.PRNGKey(0)
    kx, kt, kwg, kbg, kwb, kbb = jax.random.split(key, 6)

    x = jax.random.normal(kx, (B, C, H, W), dtype=jnp.float32)
    t = jax.random.normal(kt, (B, d_t), dtype=jnp.float32)

    # Deterministic parameter init (Linear(d_t, C) weights, stored as (d_t, C)).
    wg = jax.random.normal(kwg, (d_t, C), dtype=jnp.float32) * 0.1
    bg = jax.random.normal(kbg, (C,), dtype=jnp.float32) * 0.1
    wb = jax.random.normal(kwb, (d_t, C), dtype=jnp.float32) * 0.1
    bb = jax.random.normal(kbb, (C,), dtype=jnp.float32) * 0.1

    out = film2d(x, t, wg, bg, wb, bb)
    out = jax.block_until_ready(out)

    ref = film2d_reference(x, t, wg, bg, wb, bb)
    assert out.shape == (B, C, H, W)
    assert jnp.allclose(out, ref, atol=1e-4, rtol=1e-4), "mismatch vs reference"

    print("KERNEL_OK")
</pallas_src>

<mosaic_0001>
module attributes {stable_mosaic.version = 11 : i64} {
  func.func @film2d_kernel(%arg0: i32, %arg1: i32, %arg2: memref<2x32x256xf32, #tpu.memory_space<vmem>>, %arg3: memref<2x32x1xf32, #tpu.memory_space<vmem>>, %arg4: memref<2x32x1xf32, #tpu.memory_space<vmem>>, %arg5: memref<2x32x256xf32, #tpu.memory_space<vmem>>) attributes {dimension_semantics = [#tpu.dimension_semantics<parallel>, #tpu.dimension_semantics<parallel>], iteration_bounds = array<i64: 1, 1>, scalar_prefetch = 0 : i64, scratch_operands = 0 : i64, tpu.core_type = #tpu.core_type<tc>, window_params = [{transform_indices = @transform_0, window_bounds = array<i64: 2, 32, 256>}, {transform_indices = @transform_1, window_bounds = array<i64: 2, 32, 1>}, {transform_indices = @transform_2, window_bounds = array<i64: 2, 32, 1>}, {transform_indices = @transform_3, window_bounds = array<i64: 2, 32, 256>}]} {
    %c0 = arith.constant 0 : index
    %c0_0 = arith.constant 0 : index
    %c0_1 = arith.constant 0 : index
    %0 = vector.load %arg2[%c0, %c0_0, %c0_1] : memref<2x32x256xf32, #tpu.memory_space<vmem>>, vector<2x32x256xf32>
    %cst = arith.constant dense<0.000000e+00> : vector<2x256xf32>
    %1 = vector.multi_reduction <add>, %0, %cst [1] : vector<2x32x256xf32> to vector<2x256xf32>
    %2 = vector.shape_cast %1 : vector<2x256xf32> to vector<2x1x256xf32>
    %3 = arith.mulf %0, %0 : vector<2x32x256xf32>
    %cst_2 = arith.constant dense<0.000000e+00> : vector<2x256xf32>
    %4 = vector.multi_reduction <add>, %3, %cst_2 [1] : vector<2x32x256xf32> to vector<2x256xf32>
    %5 = vector.shape_cast %4 : vector<2x256xf32> to vector<2x1x256xf32>
    %cst_3 = arith.constant 3.125000e-02 : f32
    %6 = vector.broadcast %cst_3 : f32 to vector<2x1x256xf32>
    %7 = arith.mulf %2, %6 : vector<2x1x256xf32>
    %cst_4 = arith.constant 3.125000e-02 : f32
    %8 = vector.broadcast %cst_4 : f32 to vector<2x1x256xf32>
    %9 = arith.mulf %5, %8 : vector<2x1x256xf32>
    %10 = arith.mulf %7, %7 : vector<2x1x256xf32>
    %11 = arith.subf %9, %10 : vector<2x1x256xf32>
    %cst_5 = arith.constant 9.99999974E-6 : f32
    %12 = vector.broadcast %cst_5 : f32 to vector<2x1x256xf32>
    %13 = arith.addf %11, %12 : vector<2x1x256xf32>
    %14 = math.rsqrt %13 : vector<2x1x256xf32>
    %c0_6 = arith.constant 0 : index
    %c0_7 = arith.constant 0 : index
    %c0_8 = arith.constant 0 : index
    %15 = vector.load %arg3[%c0_6, %c0_7, %c0_8] : memref<2x32x1xf32, #tpu.memory_space<vmem>>, vector<2x32x1xf32>
    %c0_9 = arith.constant 0 : index
    %c0_10 = arith.constant 0 : index
    %c0_11 = arith.constant 0 : index
    %16 = vector.load %arg4[%c0_9, %c0_10, %c0_11] : memref<2x32x1xf32, #tpu.memory_space<vmem>>, vector<2x32x1xf32>
    %17 = vector.broadcast %15 : vector<2x32x1xf32> to vector<2x32x256xf32>
    %18 = vector.broadcast %14 : vector<2x1x256xf32> to vector<2x32x256xf32>
    %19 = arith.mulf %17, %18 : vector<2x32x256xf32>
    %20 = vector.broadcast %7 : vector<2x1x256xf32> to vector<2x32x256xf32>
    %21 = arith.subf %0, %20 : vector<2x32x256xf32>
    %22 = arith.mulf %21, %19 : vector<2x32x256xf32>
    %23 = vector.broadcast %16 : vector<2x32x1xf32> to vector<2x32x256xf32>
    %24 = arith.addf %22, %23 : vector<2x32x256xf32>
    %c0_12 = arith.constant 0 : index
    %c0_13 = arith.constant 0 : index
    %c0_14 = arith.constant 0 : index
    %25 = vector.load %arg5[%c0_12, %c0_13, %c0_14] : memref<2x32x256xf32, #tpu.memory_space<vmem>>, vector<2x32x256xf32>
    tpu.vector_store %arg5[%c0_12, %c0_13, %c0_14], %24 {strides = array<i32>} : memref<2x32x256xf32, #tpu.memory_space<vmem>>, vector<2x32x256xf32>,
    return
  }
  func.func @transform_0(%arg0: i32, %arg1: i32) -> (i32, i32, i32) {
    %c0_i32 = arith.constant 0 : i32
    %c0_i32_0 = arith.constant 0 : i32
    return %arg0, %c0_i32, %arg1 : i32, i32, i32
  }
  func.func @transform_1(%arg0: i32, %arg1: i32) -> (i32, i32, i32) {
    %c0_i32 = arith.constant 0 : i32
    %c0_i32_0 = arith.constant 0 : i32
    %c0_i32_1 = arith.constant 0 : i32
    return %arg0, %c0_i32, %c0_i32_0 : i32, i32, i32
  }
  func.func @transform_2(%arg0: i32, %arg1: i32) -> (i32, i32, i32) {
    %c0_i32 = arith.constant 0 : i32
    %c0_i32_0 = arith.constant 0 : i32
    %c0_i32_1 = arith.constant 0 : i32
    return %arg0, %c0_i32, %c0_i32_0 : i32, i32, i32
  }
  func.func @transform_3(%arg0: i32, %arg1: i32) -> (i32, i32, i32) {
    %c0_i32 = arith.constant 0 : i32
    %c0_i32_0 = arith.constant 0 : i32
    return %arg0, %c0_i32, %arg1 : i32, i32, i32
  }
}

</mosaic_0001>

<bundles_post_ra>
// kernel: tpu_custom_call.1
= control target key start
LH: loop header
LB: loop body
LE: loop exit
PB: predicated region body
PF: predicated region fallthrough
CT: control target
= control target key end

     0   :  { %v371_v2 = vmov 0   ;;  %s622_s0 = inlined_call_operand.vmem [shape: f32[2,32,256], index: 0, kind: input, shape index: {}]   ;;  %s623_s1 = inlined_call_operand.vmem [shape: f32[2,32,1], index: 1, kind: input, shape index: {}]   ;;  %s624_s2 = inlined_call_operand.vmem [shape: f32[2,32,1], index: 2, kind: input, shape index: {}]   ;;  %s625_s3 = inlined_call_operand.hbm [shape: f32[2,32,256], index: 3, kind: output, shape index: {}]  }
   0x1   :  { %v145_v0 = vld [vmem:[%s623_s1 + $0x10] sm:$0xff]  ;;  %v143_v1 = vld [vmem:[%s623_s1] sm:$0xff]  ;;  %340 = vset.pattern.permute.xlu1 %v371_v2  ;;  %339 = vset.pattern.permute.xlu0 %v371_v2  ;;  %v146_v3 = vld [vmem:[%s623_s1 + $0x18] sm:$0xff] }
   0x2   :  { %171 = vperm.xlu1 %340, %v145_v0   ;;  %161 = vperm.xlu0 %339, %v143_v1   ;;  %v144_v4 = vld [vmem:[%s623_s1 + $0x8] sm:$0xff]  ;;  %v147_v6 = vld [vmem:[%s623_s1 + $0x20] sm:$0xff] }
   0x3   :  { %v148_v5 = vld [vmem:[%s623_s1 + $0x28] sm:$0xff] }
   0x6   :  { %176 = vperm.xlu1 %340, %v146_v3   ;;  %166 = vperm.xlu0 %339, %v144_v4  }
   0xa   :  { %186 = vperm.xlu1 %340, %v148_v5   ;;  %181 = vperm.xlu0 %339, %v147_v6  }
   0xb   :  { %8 = vsyncpa [#allocation3], 0  ;;  %v150_v7 = vld [vmem:[%s623_s1 + $0x38] sm:$0xff]  ;;  %v149_v8 = vld [vmem:[%s623_s1 + $0x30] sm:$0xff] }
   0xc   :  { %v152_v9 = vld [vmem:[%s624_s2 + $0x8] sm:$0xff]  ;;  %v151_v10 = vld [vmem:[%s624_s2] sm:$0xff]  ;;  %v154_v11 = vld [vmem:[%s624_s2 + $0x18] sm:$0xff] }
   0xd   :  { %v153_v12 = vld [vmem:[%s624_s2 + $0x10] sm:$0xff]  ;;  %v156_v13 = vld [vmem:[%s624_s2 + $0x28] sm:$0xff]  ;;  %v155_v14 = vld [vmem:[%s624_s2 + $0x20] sm:$0xff] }
   0xe   :  { %196 = vperm.xlu1 %340, %v150_v7   ;;  %191 = vperm.xlu0 %339, %v149_v8   ;;  %v158_v15 = vld [vmem:[%s624_s2 + $0x38] sm:$0xff]  ;;  %v157_v16 = vld [vmem:[%s624_s2 + $0x30] sm:$0xff]  ;;  %v446_v17 = vld [vmem:[%s622_s0] sm:$0xff] }
   0xf   :  { %v451_v18 = vld [vmem:[%s622_s0 + $0x10] sm:$0xff]  ;;  %v456_v19 = vld [vmem:[%s622_s0 + $0x8] sm:$0xff]  ;;  %v461_v20 = vld [vmem:[%s622_s0 + $0x18] sm:$0xff]  ;;  %v67_v22 = vmul.f32 %v446_v17, %v446_v17 }
  0x10   :  { %v31_v21 = vadd.f32 %v451_v18, %v446_v17  ;;  %v69_v23 = vmul.f32 %v451_v18, %v451_v18  ;;  %v472_v24 = vld [vmem:[%s622_s0 + $0x20] sm:$0xff]  ;;  %v40_v25 = vadd.f32 %v461_v20, %v456_v19  ;;  %v68_v26 = vmul.f32 %v456_v19, %v456_v19  ;;  %v483_v28 = vld [vmem:[%s622_s0 + $0x28] sm:$0xff]  ;;  %v488_v29 = vld [vmem:[%s622_s0 + $0x30] sm:$0xff] }
  0x11   :  { %v70_v27 = vmul.f32 %v461_v20, %v461_v20  ;;  %v493_v30 = vld [vmem:[%s622_s0 + $0x38] sm:$0xff]  ;;  %v498_v31 = vld [vmem:[%s622_s0 + $0x40] sm:$0xff]  ;;  %v71_v33 = vmul.f32 %v472_v24, %v472_v24  ;;  %v506_v35 = vld [vmem:[%s622_s0 + $0x48] sm:$0xff]  ;;  %v72_v39 = vmul.f32 %v483_v28, %v483_v28  ;;  %v73_v41 = vmul.f32 %v488_v29, %v488_v29 }
  0x12   :  { %254 = vperm.xlu1 %340, %v152_v9   ;;  %249 = vperm.xlu0 %339, %v151_v10   ;;  %v32_v32 = vadd.f32 %v31_v21, %v472_v24  ;;  %v83_v34 = vadd.f32 %v69_v23, %v67_v22  ;;  %v511_v36 = vld [vmem:[%s622_s0 + $0x50] sm:$0xff]  ;;  %v516_v37 = vld [vmem:[%s622_s0 + $0x58] sm:$0xff]  ;;  %v41_v38 = vadd.f32 %v40_v25, %v483_v28  ;;  %v533_v47 = vld [vmem:[%s622_s0 + $0x60] sm:$0xff] }
  0x13   :  { %v92_v40 = vadd.f32 %v70_v27, %v68_v26  ;;  %v74_v42 = vmul.f32 %v493_v30, %v493_v30  ;;  %v49_v43 = vadd.f32 %v511_v36, %v498_v31  ;;  %v58_v44 = vadd.f32 %v516_v37, %v506_v35  ;;  %v538_v48 = vld [vmem:[%s622_s0 + $0x68] sm:$0xff]  ;;  %v554_v59 = vld [vmem:[%s622_s0 + $0x70] sm:$0xff]  ;;  %v559_v60 = vld [vmem:[%s622_s0 + $0x78] sm:$0xff]  ;;  %s372_s0 = smov [#allocation2]  }
  0x14   :  { %v33_v45 = vadd.f32 %v32_v32, %v488_v29  ;;  %v84_v46 = vadd.f32 %v83_v34, %v71_v33  ;;  %v75_v49 = vmul.f32 %v498_v31, %v498_v31  ;;  %v77_v50 = vmul.f32 %v511_v36, %v511_v36  ;;  %s324_s19 = sshll.u32 %s372_s0, 4  ;;  %s325_s19 = int_to_ptr.vmem [resolvable:$true] %s324_s19 }
  0x15   :  { %v42_v51 = vadd.f32 %v41_v38, %v493_v30  ;;  %v93_v52 = vadd.f32 %v92_v40, %v72_v39  ;;  %v76_v53 = vmul.f32 %v506_v35, %v506_v35  ;;  %v78_v54 = vmul.f32 %v516_v37, %v516_v37  ;;  %s349_s20 = scalar_lea.vmem %s325_s19, 2048  ;;  %p354_p1 = scmp.lt.s32.totalorder %s325_s19, %s325_s19 }
  0x16   :  { %264 = vperm.xlu1 %340, %v154_v11   ;;  %259 = vperm.xlu0 %339, %v153_v12   ;;  %v50_v55 = vadd.f32 %v49_v43, %v533_v47  ;;  %v59_v56 = vadd.f32 %v58_v44, %v538_v48  ;;  %v34_v57 = vrot.slane %v33_v45, 4  ;;  %v85_v58 = vadd.f32 %v84_v46, %v73_v41  ;;  %p350_p0 = scmp.ne.s32.totalorder %s325_s19, %s349_s20  ;;  %p355_p2 = scmp.lt.s32.totalorder %s349_s20, %s349_s20 }
  0x17   :  { %v79_v61 = vmul.f32 %v533_v47, %v533_v47  ;;  %v101_v62 = vadd.f32 %v77_v50, %v75_v49  ;;  %v43_v63 = vrot.slane %v42_v51, 4  ;;  %v94_v0 = vadd.f32 %v93_v52, %v74_v42 }
  0x18   :  { %v80_v1 = vmul.f32 %v538_v48, %v538_v48  ;;  %v110_v2 = vadd.f32 %v78_v54, %v76_v53  ;;  %v51_v3 = vadd.f32 %v50_v55, %v554_v59  ;;  %v60_v4 = vadd.f32 %v59_v56, %v559_v60  ;;  %p356_p3 = por %p355_p2, %p354_p1 }
  0x19   :  { %v35_v5 = vadd.f32 %v34_v57, %v33_v45  ;;  %v86_v6 = vrot.slane %v85_v58, 4  ;;  %v81_v7 = vmul.f32 %v554_v59, %v554_v59  ;;  %v102_v8 = vadd.f32 %v101_v62, %v79_v61 }
  0x1a   :  { %274 = vperm.xlu1 %340, %v156_v13   ;;  %269 = vperm.xlu0 %339, %v155_v14   ;;  %v44_v9 = vadd.f32 %v43_v63, %v42_v51  ;;  %v95_v10 = vrot.slane %v94_v0, 4  ;;  %v82_v11 = vmul.f32 %v559_v60, %v559_v60  ;;  %v111_v12 = vadd.f32 %v110_v2, %v80_v1  ;;  %p357_p4 = pnand %p356_p3, %p350_p0 }
  0x1b   :  { %v36_v13 = vrot.slane %v35_v5, 2  ;;  %v87_v14 = vadd.f32 %v86_v6, %v85_v58  ;;  %v61_v23 = vrot.slane %v60_v4, 4 }
  0x1c   :  { %v45_v21 = vrot.slane %v44_v9, 2  ;;  %v96_v22 = vadd.f32 %v95_v10, %v94_v0  ;;  %v112_v25 = vadd.f32 %v111_v12, %v82_v11 }
  0x1d   :  { %v37_v26 = vadd.f32 %v36_v13, %v35_v5  ;;  %v88_v27 = vrot.slane %v87_v14, 2  ;;  %v62_v39 = vadd.f32 %v61_v23, %v60_v4 }
  0x1e   :  { %284 = vperm.xlu1 %340, %v158_v15   ;;  %279 = vperm.xlu0 %339, %v157_v16   ;;  %v52_v15 = vrot.slane %v51_v3, 4  ;;  %v103_v16 = vadd.f32 %v102_v8, %v81_v7  ;;  %v46_v34 = vadd.f32 %v45_v21, %v44_v9  ;;  %v97_v38 = vrot.slane %v96_v22, 2 }
  0x1f   :  { %v113_v40 = vrot.slane %v112_v25, 4  ;;  %v38_v41 = vrot.slane %v37_v26, 1  ;;  %v89_v42 = vadd.f32 %v88_v27, %v87_v14  ;;  %v63_v49 = vrot.slane %v62_v39, 2 }
  0x20   :  { %v53_v32 = vadd.f32 %v52_v15, %v51_v3  ;;  %v104_v33 = vrot.slane %v103_v16, 4  ;;  %v47_v45 = vrot.slane %v46_v34, 1  ;;  %v98_v46 = vadd.f32 %v97_v38, %v96_v22 }
  0x21   :  { %v114_v50 = vadd.f32 %v113_v40, %v112_v25  ;;  %v39_v51 = vadd.f32 %v38_v41, %v37_v26  ;;  %v90_v52 = vrot.slane %v89_v42, 1  ;;  %v64_v57 = vadd.f32 %v63_v49, %v62_v39 }
  0x22   :  { %v54_v43 = vrot.slane %v53_v32, 2  ;;  %v105_v44 = vadd.f32 %v104_v33, %v103_v16  ;;  %v48_v55 = vadd.f32 %v47_v45, %v46_v34  ;;  %v99_v56 = vrot.slane %v98_v46, 1 }
  0x23   :  { %v115_v58 = vrot.slane %v114_v50, 2  ;;  %v91_v61 = vadd.f32 %v90_v52, %v89_v42  ;;  %v571_v62 = vmul.f32 0.03125, %v39_v51  ;;  %v65_v3 = vrot.slane %v64_v57, 1 }
  0x24   :  { %v55_v53 = vadd.f32 %v54_v43, %v53_v32  ;;  %v106_v54 = vrot.slane %v105_v44, 2  ;;  %v100_v1 = vadd.f32 %v99_v56, %v98_v46  ;;  %v573_v2 = vmul.f32 0.03125, %v48_v55 }
  0x25   :  { %v116_v4 = vadd.f32 %v115_v58, %v114_v50  ;;  %v123_v5 = vmul.f32 0.03125, %v91_v61  ;;  %v127_v6 = vmul.f32 %v571_v62, %v571_v62  ;;  %v66_v11 = vadd.f32 %v65_v3, %v64_v57 }
  0x26   :  { %v56_v63 = vrot.slane %v55_v53, 1  ;;  %v107_v0 = vadd.f32 %v106_v54, %v105_v44  ;;  %v124_v9 = vmul.f32 0.03125, %v100_v1  ;;  %v128_v10 = vmul.f32 %v573_v2, %v573_v2 }
  0x27   :  { %v117_v12 = vrot.slane %v116_v4, 1  ;;  %v131_v13 = vsub.f32 %v123_v5, %v127_v6  ;;  %v581_v22 = vmul.f32 0.03125, %v66_v11  ;;  %v216_v54 = vsub.f32 %v456_v19, %v573_v2 }
  0x28   :  { %v57_v7 = vadd.f32 %v56_v63, %v55_v53  ;;  %v108_v8 = vrot.slane %v107_v0, 1  ;;  %v132_v16 = vsub.f32 %v124_v9, %v128_v10  ;;  %v215_v53 = vsub.f32 %v446_v17, %v571_v62 }
  0x29   :  { %v118_v21 = vadd.f32 %v117_v12, %v116_v4  ;;  %v135_v23 = vadd.f32 1e-05, %v131_v13  ;;  %v130_v33 = vmul.f32 %v581_v22, %v581_v22  ;;  %v217_v57 = vsub.f32 %v451_v18, %v571_v62 }
  0x2a   :  { %v109_v14 = vadd.f32 %v108_v8, %v107_v0  ;;  %v579_v15 = vmul.f32 0.03125, %v57_v7  ;;  %v136_v27 = vadd.f32 1e-05, %v132_v16  ;;  %v218_v58 = vsub.f32 %v461_v20, %v573_v2 }
  0x2b   :  { %v126_v32 = vmul.f32 0.03125, %v118_v21  ;;  %341 = vrsqrt.f32 %v135_v23  ;;  %v221_v0 = vsub.f32 %v488_v29, %v571_v62  ;;  %v222_v1 = vsub.f32 %v493_v30, %v573_v2 }
  0x2c   :  { %v125_v25 = vmul.f32 0.03125, %v109_v14  ;;  %v129_v26 = vmul.f32 %v579_v15, %v579_v15  ;;  %343 = vrsqrt.f32 %v136_v27  ;;  %v219_v17 = vsub.f32 %v472_v24, %v571_v62 }
  0x2d   :  { %v134_v38 = vsub.f32 %v126_v32, %v130_v33  ;;  %v220_v19 = vsub.f32 %v483_v28, %v573_v2  ;;  %v225_v30 = vsub.f32 %v511_v36, %v579_v15  ;;  %v226_v24 = vsub.f32 %v516_v37, %v581_v22 }
  0x2e   :  { %v133_v34 = vsub.f32 %v125_v25, %v129_v26  ;;  %v223_v28 = vsub.f32 %v498_v31, %v579_v15  ;;  %v224_v62 = vsub.f32 %v506_v35, %v581_v22  ;;  %v229_v35 = vsub.f32 %v554_v59, %v579_v15 }
  0x2f   :  { %v138_v40 = vadd.f32 1e-05, %v134_v38  ;;  %v230_v33 = vsub.f32 %v559_v60, %v581_v22  ;;  %v228_v38 = vsub.f32 %v538_v48, %v581_v22 }
  0x30   :  { %v137_v39 = vadd.f32 1e-05, %v133_v34  ;;  %v227_v34 = vsub.f32 %v533_v47, %v579_v15 }
  0x32   :  { %345 = vrsqrt.f32 %v137_v39 }
  0x33   :  { %347 = vrsqrt.f32 %v138_v40 }
  0x38   :  { %v342_v45 = vpop.eup %341 }
  0x39   :  { %v344_v46 = vpop.eup %343 }
  0x3f   :  { %v346_v3 = vpop.eup %345 }
  0x40   :  { %v348_v20 = vpop.eup %347 }
  0x7d   :  { %v172_v41 = vpop.permute.xlu1 %171  ;;  %v162_v42 = vpop.permute.xlu0 %161 }
  0x7e   :  { %v199_v51 = vmul.f32 %v342_v45, %v162_v42  ;;  %v200_v52 = vmul.f32 %v344_v46, %v162_v42  ;;  %v203_v4 = vmul.f32 %v342_v45, %v172_v41  ;;  %v204_v18 = vmul.f32 %v344_v46, %v172_v41 }
  0x80   :  { %v231_v5 = vmul.f32 %v215_v53, %v199_v51  ;;  %v232_v6 = vmul.f32 %v216_v54, %v200_v52  ;;  %v235_v26 = vmul.f32 %v219_v17, %v203_v4  ;;  %v236_v27 = vmul.f32 %v220_v19, %v204_v18 }
  0x81   :  { %v177_v43 = vpop.permute.xlu1 %176  ;;  %v167_v44 = vpop.permute.xlu0 %166 }
  0x82   :  { %v201_v55 = vmul.f32 %v342_v45, %v167_v44  ;;  %v202_v56 = vmul.f32 %v344_v46, %v167_v44  ;;  %v205_v7 = vmul.f32 %v342_v45, %v177_v43  ;;  %v206_v8 = vmul.f32 %v344_v46, %v177_v43 }
  0x84   :  { %v233_v9 = vmul.f32 %v217_v57, %v201_v55  ;;  %v234_v10 = vmul.f32 %v218_v58, %v202_v56  ;;  %v237_v36 = vmul.f32 %v221_v0, %v205_v7  ;;  %v238_v37 = vmul.f32 %v222_v1, %v206_v8 }
  0x85   :  { %v187_v49 = vpop.permute.xlu1 %186  ;;  %v182_v50 = vpop.permute.xlu0 %181 }
  0x86   :  { %v209_v16 = vmul.f32 %v346_v3, %v187_v49  ;;  %v210_v21 = vmul.f32 %v348_v20, %v187_v49  ;;  %v207_v23 = vmul.f32 %v346_v3, %v182_v50  ;;  %v208_v25 = vmul.f32 %v348_v20, %v182_v50 }
  0x88   :  { %v241_v43 = vmul.f32 %v225_v30, %v209_v16  ;;  %v242_v44 = vmul.f32 %v226_v24, %v210_v21  ;;  %v239_v45 = vmul.f32 %v223_v28, %v207_v23  ;;  %v240_v46 = vmul.f32 %v224_v62, %v208_v25 }
  0x89   :  { %v197_v61 = vpop.permute.xlu1 %196  ;;  %v192_v63 = vpop.permute.xlu0 %191 }
  0x8a   :  { %v213_v49 = vmul.f32 %v346_v3, %v197_v61  ;;  %v214_v50 = vmul.f32 %v348_v20, %v197_v61  ;;  %v211_v59 = vmul.f32 %v346_v3, %v192_v63  ;;  %v212_v51 = vmul.f32 %v348_v20, %v192_v63 }
  0x8c   :  { %v245_v53 = vmul.f32 %v229_v35, %v213_v49  ;;  %v246_v54 = vmul.f32 %v230_v33, %v214_v50  ;;  %v243_v55 = vmul.f32 %v227_v34, %v211_v59  ;;  %v244_v56 = vmul.f32 %v228_v38, %v212_v51 }
  0x8d   :  { %v255_v29 = vpop.permute.xlu1 %254  ;;  %v250_v11 = vpop.permute.xlu0 %249 }
  0x8e   :  { %v289_v2 = vadd.f32 %v255_v29, %v233_v9  ;;  %v290_v12 = vadd.f32 %v255_v29, %v234_v10  ;;  %v287_v13 = vadd.f32 %v250_v11, %v231_v5  ;;  %v288_v14 = vadd.f32 %v250_v11, %v232_v6 }
  0x90   :  { %305 = vst [vmem:[#allocation2 + $0x10] sm:$0xff] %v289_v2  ;;  %306 = vst [vmem:[#allocation2 + $0x18] sm:$0xff] %v290_v12 }
  0x91   :  { %303 = vst [vmem:[#allocation2] sm:$0xff] %v287_v13  ;;  %304 = vst [vmem:[#allocation2 + $0x8] sm:$0xff] %v288_v14  ;;  %v265_v31 = vpop.permute.xlu1 %264  ;;  %v260_v32 = vpop.permute.xlu0 %259 }
  0x92   :  { %v293_v39 = vadd.f32 %v265_v31, %v237_v36  ;;  %v294_v40 = vadd.f32 %v265_v31, %v238_v37  ;;  %v291_v41 = vadd.f32 %v260_v32, %v235_v26  ;;  %v292_v42 = vadd.f32 %v260_v32, %v236_v27 }
  0x94   :  { %309 = vst [vmem:[#allocation2 + $0x30] sm:$0xff] %v293_v39  ;;  %310 = vst [vmem:[#allocation2 + $0x38] sm:$0xff] %v294_v40 }
  0x95   :  { %307 = vst [vmem:[#allocation2 + $0x20] sm:$0xff] %v291_v41  ;;  %308 = vst [vmem:[#allocation2 + $0x28] sm:$0xff] %v292_v42  ;;  %v275_v47 = vpop.permute.xlu1 %274  ;;  %v270_v60 = vpop.permute.xlu0 %269 }
  0x96   :  { %v297_v15 = vadd.f32 %v275_v47, %v241_v43  ;;  %v298_v48 = vadd.f32 %v275_v47, %v242_v44  ;;  %v295_v22 = vadd.f32 %v270_v60, %v239_v45  ;;  %v296_v52 = vadd.f32 %v270_v60, %v240_v46 }
  0x98   :  { %313 = vst [vmem:[#allocation2 + $0x50] sm:$0xff] %v297_v15  ;;  %314 = vst [vmem:[#allocation2 + $0x58] sm:$0xff] %v298_v48 }
  0x99   :  { %311 = vst [vmem:[#allocation2 + $0x40] sm:$0xff] %v295_v22  ;;  %312 = vst [vmem:[#allocation2 + $0x48] sm:$0xff] %v296_v52  ;;  %v285_v57 = vpop.permute.xlu1 %284  ;;  %v280_v58 = vpop.permute.xlu0 %279 }
  0x9a   :  { %v301_v61 = vadd.f32 %v285_v57, %v245_v53  ;;  %v302_v63 = vadd.f32 %v285_v57, %v246_v54  ;;  %v299_v0 = vadd.f32 %v280_v58, %v243_v55  ;;  %v300_v1 = vadd.f32 %v280_v58, %v244_v56 }
  0x9c   :  { %317 = vst [vmem:[#allocation2 + $0x70] sm:$0xff] %v301_v61  ;;  %318 = vst [vmem:[#allocation2 + $0x78] sm:$0xff] %v302_v63 }
  0x9d   :  { %315 = vst [vmem:[#allocation2 + $0x60] sm:$0xff] %v299_v0  ;;  %316 = vst [vmem:[#allocation2 + $0x68] sm:$0xff] %v300_v1 }
  0x9e   :  { %360 = shalt.err (!%p357_p4)
}
  0x9f   :  { %s373_s21 = smov 256   ;;  %s374_s22 = smov 16  }
  0xa0   :  { %330 = dma.vmem_to_hbm [thread:$0]  %s325_s19, 2048, %s625_s3, [#allocation3], %s373_s21, %s373_s21, %s374_s22  }
  0xa1   :  { %369 = dma.done.wait [#allocation3], 2048  }
  0xa2   :  { %370 = vsyncadd [#allocation3], 4294965248 }
  0xa3   :  { %334 = vsyncpa [#allocation3], 1 }

</bundles_post_ra>
